<compile_context>
chip_gen: v7x
topology: tpu7x:2x2x1
jax: 0.10.0
libtpu: 0.0.40
codegen_flags: <defaults>
</compile_context>

<pallas_src>
import functools

import jax
import jax.numpy as jnp
import numpy as np
from jax.experimental import pallas as pl
from jax.experimental.pallas import tpu as pltpu

# Offsets in the exact order used by the PyTorch reference:
# [(u, v) for v in range(3) for u in range(3) if not u == 1 == v]
_OFFSETS = [(u, v) for v in range(3) for u in range(3) if not (u == 1 and v == 1)]
# census = census << 1 | bit  =>  first offset carries weight 2^7, last 2^0.
_WEIGHTS = [float(1 << (7 - k)) for k in range(len(_OFFSETS))]


def _shift(x, d, axis):
    """Circular shift: result[..., i, ...] = x[..., (i + d) % n, ...] (static d)."""
    n = x.shape[axis]
    s = (-d) % n
    if s == 0:
        return x
    return pltpu.roll(x, shift=s, axis=axis)


def _census_slab(x, plane_w):
    """Census transform + reflect pad of one (H, F*W) slab.

    The slab packs F = WF // plane_w independent planes side by side along the
    lane axis. The output only reads census centers in [1, H-2] x [1, W-2] of
    each plane, so roll wrap-around (rows 0/H-1, plane seams) never leaks into
    the result.
    """
    h, wf = x.shape
    fold = wf // plane_w

    # Row-shifted copies, shared by the three column offsets of each row.
    row_sh = {dv: _shift(x, dv, axis=0) for dv in (-1, 0, 1)}

    # Independent weighted bits + log-depth tree sum (ILP across VALU slots).
    # Partial sums are sums of distinct powers of two -> exact integers in f32.
    terms = []
    for w_k, (u, v) in zip(_WEIGHTS, _OFFSETS):
        du, dv = u - 1, v - 1
        nb = _shift(row_sh[dv], du, axis=1)          # nb[i, L] = x[i+dv, L+du]
        terms.append(jnp.where(nb >= x, jnp.float32(w_k), jnp.float32(0.0)))
    while len(terms) > 1:
        terms = [terms[i] + terms[i + 1] for i in range(0, len(terms), 2)]
    census = terms[0] / jnp.float32(255.0)           # same op as torch: c / 255

    # Reflect pad by 1 (PyTorch 'reflect'): border rows/cols take the census
    # value two rows/cols inwards. Full-tile rolls + iota-mask selects only.
    row = jax.lax.broadcasted_iota(jnp.int32, (h, wf), 0)
    col = jax.lax.broadcasted_iota(jnp.int32, (h, wf), 1)

    out = jnp.where(row == 0, _shift(census, 2, axis=0), census)
    out = jnp.where(row == h - 1, _shift(census, -2, axis=0), out)

    is_left = functools.reduce(
        jnp.logical_or, [col == f * plane_w for f in range(fold)])
    is_right = functools.reduce(
        jnp.logical_or, [col == f * plane_w + plane_w - 1 for f in range(fold)])
    out = jnp.where(is_left, _shift(out, 2, axis=1), out)
    out = jnp.where(is_right, _shift(out, -2, axis=1), out)
    return out


def _census_kernel(x_ref, o_ref, *, plane_w):
    # x_ref / o_ref blocks: (PB, H, F*W). Small static unroll over the PB slabs.
    for p in range(x_ref.shape[0]):
        o_ref[p] = _census_slab(x_ref[p], plane_w).astype(o_ref.dtype)


def _largest_divisor_leq(n, cap):
    cap = max(1, min(n, cap))
    for d in range(cap, 0, -1):
        if n % d == 0:
            return d
    return 1


def _choose_slab_batch(num_slabs, slab_bytes, max_batch=8,
                       budget_bytes=2 * 1024 * 1024):
    """Largest divisor of num_slabs keeping the block small (double-buffered
    working set fits every generation's scoped VMEM), the in-kernel unroll
    short, and >= 2 grid steps so both v7x TensorCores get work."""
    if num_slabs <= 1:
        return 1
    best = 1
    for pb in range(1, min(num_slabs // 2, max_batch) + 1):
        if num_slabs % pb == 0 and pb * slab_bytes <= budget_bytes:
            best = pb
    return best


def census_transform_pallas(x, kernel_size=3):
    """Census transform of a [N, C, H, W] batch (per channel), Pallas on TPU."""
    if kernel_size != 3:
        raise NotImplementedError
    assert x.ndim == 4
    n, c, h, w = x.shape
    assert h >= 4 and w >= 4, "reflect padding of the census requires H >= 4 and W >= 4"
    nc = n * c
    xf = x.reshape(nc, h, w)

    # Lane folding: pack `fold` planes side by side along W so the trailing dim
    # approaches a full 128-lane vreg (layout plumbing only, done in XLA).
    fold = _largest_divisor_leq(nc, 128 // w) if w < 128 else 1
    num_slabs = nc // fold
    wf = fold * w
    if fold > 1:
        xs = xf.reshape(num_slabs, fold, h, w).transpose(0, 2, 1, 3)
        xs = xs.reshape(num_slabs, h, wf)
    else:
        xs = xf

    pb = _choose_slab_batch(num_slabs, h * wf * xs.dtype.itemsize)
    grid = num_slabs // pb
    # Note: very large single planes (>~1 MiB) would additionally want row
    # tiling / a raised vmem_limit_bytes on v5e; not needed at these sizes.

    cost = pl.CostEstimate(
        flops=16 * nc * h * w,                        # 8 compares + ~8 adds/selects
        transcendentals=0,
        bytes_accessed=nc * h * w * (xs.dtype.itemsize + 4))

    out = pl.pallas_call(
        functools.partial(_census_kernel, plane_w=w),
        out_shape=jax.ShapeDtypeStruct((num_slabs, h, wf), jnp.float32),
        grid=(grid,),
        in_specs=[pl.BlockSpec((pb, h, wf), lambda i: (i, 0, 0))],
        out_specs=pl.BlockSpec((pb, h, wf), lambda i: (i, 0, 0)),
        compiler_params=pltpu.CompilerParams(
            dimension_semantics=("parallel",)),
        cost_estimate=cost,
    )(xs)

    if fold > 1:
        out = out.reshape(num_slabs, h, fold, w).transpose(0, 2, 1, 3)
    return out.reshape(n, c, h, w)


def census_loss_pallas(predicted, target, kernel_size=3):
    """CensusLoss.forward: MSE between the census transforms of two images."""
    cp = census_transform_pallas(predicted, kernel_size)
    ct = census_transform_pallas(target, kernel_size)
    return jnp.mean((cp - ct) ** 2)


class CensusLossPallas:
    def __init__(self, kernel_size=3):
        self._kernel_size = kernel_size

    def __call__(self, predicted, target):
        return census_loss_pallas(predicted, target, self._kernel_size)


# ----------------------------- pure-JAX reference ----------------------------

def census_transform_ref(img, kernel_size=3):
    if kernel_size != 3:
        raise NotImplementedError
    n, c, h, w = img.shape
    cp = img[:, :, 1:h - 1, 1:w - 1]
    census = jnp.zeros((n, c, h - 2, w - 2), jnp.float32)
    for u, v in _OFFSETS:
        bit = (img[:, :, v:v + h - 2, u:u + w - 2] >= cp).astype(jnp.float32)
        census = census * 2.0 + bit
    census = census / 255.0
    return jnp.pad(census, ((0, 0), (0, 0), (1, 1), (1, 1)), mode="reflect")


def census_loss_ref(predicted, target, kernel_size=3):
    cp = census_transform_ref(predicted, kernel_size)
    ct = census_transform_ref(target, kernel_size)
    return jnp.mean((cp - ct) ** 2)


if __name__ == "__main__":
    key = jax.random.PRNGKey(0)
    k1, k2 = jax.random.split(key)
    predicted = jax.random.uniform(k1, (2, 4, 16, 16), dtype=jnp.float32)
    target = jax.random.uniform(k2, (2, 4, 16, 16), dtype=jnp.float32)

    census = jax.block_until_ready(census_transform_pallas(predicted))
    assert census.shape == (2, 4, 16, 16) and census.dtype == jnp.float32
    np.testing.assert_allclose(np.asarray(census),
                               np.asarray(census_transform_ref(predicted)),
                               rtol=0, atol=1e-6)

    loss = jax.block_until_ready(CensusLossPallas()(predicted, target))
    np.testing.assert_allclose(np.asarray(loss),
                               np.asarray(census_loss_ref(predicted, target)),
                               rtol=1e-6, atol=1e-7)

    print("KERNEL_OK")
</pallas_src>

<mosaic_0001>
module attributes {stable_mosaic.version = 11 : i64} {
  func.func @_census_kernel(%arg0: i32, %arg1: memref<1x16x128xf32, #tpu.memory_space<vmem>>, %arg2: memref<1x16x128xf32, #tpu.memory_space<vmem>>) attributes {dimension_semantics = [#tpu.dimension_semantics<parallel>], iteration_bounds = array<i64: 1>, scalar_prefetch = 0 : i64, scratch_operands = 0 : i64, tpu.core_type = #tpu.core_type<tc>, window_params = [{transform_indices = @transform_0, window_bounds = array<i64: 1, 16, 128>}, {transform_indices = @transform_1, window_bounds = array<i64: 1, 16, 128>}]} {
    %c0 = arith.constant 0 : index
    %c0_0 = arith.constant 0 : index
    %c0_1 = arith.constant 0 : index
    %0 = vector.load %arg1[%c0, %c0_0, %c0_1] : memref<1x16x128xf32, #tpu.memory_space<vmem>>, vector<1x16x128xf32>
    %1 = vector.shape_cast %0 : vector<1x16x128xf32> to vector<16x128xf32>
    %c1_i32 = arith.constant 1 : i32
    %2 = tpu.dynamic_rotate %1 by %c1_i32 dim 0 : vector<16x128xf32>, i32 -> vector<16x128xf32>
    %c15_i32 = arith.constant 15 : i32
    %3 = tpu.dynamic_rotate %1 by %c15_i32 dim 0 : vector<16x128xf32>, i32 -> vector<16x128xf32>
    %c1_i32_2 = arith.constant 1 : i32
    %4 = tpu.dynamic_rotate %2 by %c1_i32_2 dim 1 : vector<16x128xf32>, i32 -> vector<16x128xf32>
    %5 = arith.cmpf oge, %4, %1 : vector<16x128xf32>
    %cst = arith.constant 1.280000e+02 : f32
    %cst_3 = arith.constant 0.000000e+00 : f32
    %6 = vector.broadcast %cst : f32 to vector<16x128xf32>
    %7 = vector.broadcast %cst_3 : f32 to vector<16x128xf32>
    %8 = arith.select %5, %6, %7 : vector<16x128xi1>, vector<16x128xf32>
    %9 = arith.cmpf oge, %2, %1 : vector<16x128xf32>
    %cst_4 = arith.constant 6.400000e+01 : f32
    %cst_5 = arith.constant 0.000000e+00 : f32
    %10 = vector.broadcast %cst_4 : f32 to vector<16x128xf32>
    %11 = vector.broadcast %cst_5 : f32 to vector<16x128xf32>
    %12 = arith.select %9, %10, %11 : vector<16x128xi1>, vector<16x128xf32>
    %c127_i32 = arith.constant 127 : i32
    %13 = tpu.dynamic_rotate %2 by %c127_i32 dim 1 : vector<16x128xf32>, i32 -> vector<16x128xf32>
    %14 = arith.cmpf oge, %13, %1 : vector<16x128xf32>
    %cst_6 = arith.constant 3.200000e+01 : f32
    %cst_7 = arith.constant 0.000000e+00 : f32
    %15 = vector.broadcast %cst_6 : f32 to vector<16x128xf32>
    %16 = vector.broadcast %cst_7 : f32 to vector<16x128xf32>
    %17 = arith.select %14, %15, %16 : vector<16x128xi1>, vector<16x128xf32>
    %c1_i32_8 = arith.constant 1 : i32
    %18 = tpu.dynamic_rotate %1 by %c1_i32_8 dim 1 : vector<16x128xf32>, i32 -> vector<16x128xf32>
    %19 = arith.cmpf oge, %18, %1 : vector<16x128xf32>
    %cst_9 = arith.constant 1.600000e+01 : f32
    %cst_10 = arith.constant 0.000000e+00 : f32
    %20 = vector.broadcast %cst_9 : f32 to vector<16x128xf32>
    %21 = vector.broadcast %cst_10 : f32 to vector<16x128xf32>
    %22 = arith.select %19, %20, %21 : vector<16x128xi1>, vector<16x128xf32>
    %c127_i32_11 = arith.constant 127 : i32
    %23 = tpu.dynamic_rotate %1 by %c127_i32_11 dim 1 : vector<16x128xf32>, i32 -> vector<16x128xf32>
    %24 = arith.cmpf oge, %23, %1 : vector<16x128xf32>
    %cst_12 = arith.constant 8.000000e+00 : f32
    %cst_13 = arith.constant 0.000000e+00 : f32
    %25 = vector.broadcast %cst_12 : f32 to vector<16x128xf32>
    %26 = vector.broadcast %cst_13 : f32 to vector<16x128xf32>
    %27 = arith.select %24, %25, %26 : vector<16x128xi1>, vector<16x128xf32>
    %c1_i32_14 = arith.constant 1 : i32
    %28 = tpu.dynamic_rotate %3 by %c1_i32_14 dim 1 : vector<16x128xf32>, i32 -> vector<16x128xf32>
    %29 = arith.cmpf oge, %28, %1 : vector<16x128xf32>
    %cst_15 = arith.constant 4.000000e+00 : f32
    %cst_16 = arith.constant 0.000000e+00 : f32
    %30 = vector.broadcast %cst_15 : f32 to vector<16x128xf32>
    %31 = vector.broadcast %cst_16 : f32 to vector<16x128xf32>
    %32 = arith.select %29, %30, %31 : vector<16x128xi1>, vector<16x128xf32>
    %33 = arith.cmpf oge, %3, %1 : vector<16x128xf32>
    %cst_17 = arith.constant 2.000000e+00 : f32
    %cst_18 = arith.constant 0.000000e+00 : f32
    %34 = vector.broadcast %cst_17 : f32 to vector<16x128xf32>
    %35 = vector.broadcast %cst_18 : f32 to vector<16x128xf32>
    %36 = arith.select %33, %34, %35 : vector<16x128xi1>, vector<16x128xf32>
    %c127_i32_19 = arith.constant 127 : i32
    %37 = tpu.dynamic_rotate %3 by %c127_i32_19 dim 1 : vector<16x128xf32>, i32 -> vector<16x128xf32>
    %38 = arith.cmpf oge, %37, %1 : vector<16x128xf32>
    %cst_20 = arith.constant 1.000000e+00 : f32
    %cst_21 = arith.constant 0.000000e+00 : f32
    %39 = vector.broadcast %cst_20 : f32 to vector<16x128xf32>
    %40 = vector.broadcast %cst_21 : f32 to vector<16x128xf32>
    %41 = arith.select %38, %39, %40 : vector<16x128xi1>, vector<16x128xf32>
    %42 = arith.addf %8, %12 : vector<16x128xf32>
    %43 = arith.addf %17, %22 : vector<16x128xf32>
    %44 = arith.addf %27, %32 : vector<16x128xf32>
    %45 = arith.addf %36, %41 : vector<16x128xf32>
    %46 = arith.addf %42, %43 : vector<16x128xf32>
    %47 = arith.addf %44, %45 : vector<16x128xf32>
    %48 = arith.addf %46, %47 : vector<16x128xf32>
    %cst_22 = arith.constant 2.550000e+02 : f32
    %49 = vector.broadcast %cst_22 : f32 to vector<16x128xf32>
    %50 = arith.divf %48, %49 : vector<16x128xf32>
    %51 = tpu.iota {dimensions = array<i32: 0>} : vector<16x128xi32>
    %52 = tpu.iota {dimensions = array<i32: 1>} : vector<16x128xi32>
    %c0_i32 = arith.constant 0 : i32
    %53 = vector.broadcast %c0_i32 : i32 to vector<16x128xi32>
    %54 = arith.cmpi eq, %51, %53 : vector<16x128xi32>
    %c14_i32 = arith.constant 14 : i32
    %55 = tpu.dynamic_rotate %50 by %c14_i32 dim 0 : vector<16x128xf32>, i32 -> vector<16x128xf32>
    %56 = arith.select %54, %55, %50 : vector<16x128xi1>, vector<16x128xf32>
    %c15_i32_23 = arith.constant 15 : i32
    %57 = vector.broadcast %c15_i32_23 : i32 to vector<16x128xi32>
    %58 = arith.cmpi eq, %51, %57 : vector<16x128xi32>
    %c2_i32 = arith.constant 2 : i32
    %59 = tpu.dynamic_rotate %50 by %c2_i32 dim 0 : vector<16x128xf32>, i32 -> vector<16x128xf32>
    %60 = arith.select %58, %59, %56 : vector<16x128xi1>, vector<16x128xf32>
    %c0_i32_24 = arith.constant 0 : i32
    %61 = vector.broadcast %c0_i32_24 : i32 to vector<16x128xi32>
    %62 = arith.cmpi eq, %52, %61 : vector<16x128xi32>
    %c16_i32 = arith.constant 16 : i32
    %63 = vector.broadcast %c16_i32 : i32 to vector<16x128xi32>
    %64 = arith.cmpi eq, %52, %63 : vector<16x128xi32>
    %c32_i32 = arith.constant 32 : i32
    %65 = vector.broadcast %c32_i32 : i32 to vector<16x128xi32>
    %66 = arith.cmpi eq, %52, %65 : vector<16x128xi32>
    %c48_i32 = arith.constant 48 : i32
    %67 = vector.broadcast %c48_i32 : i32 to vector<16x128xi32>
    %68 = arith.cmpi eq, %52, %67 : vector<16x128xi32>
    %c64_i32 = arith.constant 64 : i32
    %69 = vector.broadcast %c64_i32 : i32 to vector<16x128xi32>
    %70 = arith.cmpi eq, %52, %69 : vector<16x128xi32>
    %c80_i32 = arith.constant 80 : i32
    %71 = vector.broadcast %c80_i32 : i32 to vector<16x128xi32>
    %72 = arith.cmpi eq, %52, %71 : vector<16x128xi32>
    %c96_i32 = arith.constant 96 : i32
    %73 = vector.broadcast %c96_i32 : i32 to vector<16x128xi32>
    %74 = arith.cmpi eq, %52, %73 : vector<16x128xi32>
    %c112_i32 = arith.constant 112 : i32
    %75 = vector.broadcast %c112_i32 : i32 to vector<16x128xi32>
    %76 = arith.cmpi eq, %52, %75 : vector<16x128xi32>
    %77 = arith.ori %62, %64 : vector<16x128xi1>
    %78 = arith.ori %77, %66 : vector<16x128xi1>
    %79 = arith.ori %78, %68 : vector<16x128xi1>
    %80 = arith.ori %79, %70 : vector<16x128xi1>
    %81 = arith.ori %80, %72 : vector<16x128xi1>
    %82 = arith.ori %81, %74 : vector<16x128xi1>
    %83 = arith.ori %82, %76 : vector<16x128xi1>
    %c15_i32_25 = arith.constant 15 : i32
    %84 = vector.broadcast %c15_i32_25 : i32 to vector<16x128xi32>
    %85 = arith.cmpi eq, %52, %84 : vector<16x128xi32>
    %c31_i32 = arith.constant 31 : i32
    %86 = vector.broadcast %c31_i32 : i32 to vector<16x128xi32>
    %87 = arith.cmpi eq, %52, %86 : vector<16x128xi32>
    %c47_i32 = arith.constant 47 : i32
    %88 = vector.broadcast %c47_i32 : i32 to vector<16x128xi32>
    %89 = arith.cmpi eq, %52, %88 : vector<16x128xi32>
    %c63_i32 = arith.constant 63 : i32
    %90 = vector.broadcast %c63_i32 : i32 to vector<16x128xi32>
    %91 = arith.cmpi eq, %52, %90 : vector<16x128xi32>
    %c79_i32 = arith.constant 79 : i32
    %92 = vector.broadcast %c79_i32 : i32 to vector<16x128xi32>
    %93 = arith.cmpi eq, %52, %92 : vector<16x128xi32>
    %c95_i32 = arith.constant 95 : i32
    %94 = vector.broadcast %c95_i32 : i32 to vector<16x128xi32>
    %95 = arith.cmpi eq, %52, %94 : vector<16x128xi32>
    %c111_i32 = arith.constant 111 : i32
    %96 = vector.broadcast %c111_i32 : i32 to vector<16x128xi32>
    %97 = arith.cmpi eq, %52, %96 : vector<16x128xi32>
    %c127_i32_26 = arith.constant 127 : i32
    %98 = vector.broadcast %c127_i32_26 : i32 to vector<16x128xi32>
    %99 = arith.cmpi eq, %52, %98 : vector<16x128xi32>
    %100 = arith.ori %85, %87 : vector<16x128xi1>
    %101 = arith.ori %100, %89 : vector<16x128xi1>
    %102 = arith.ori %101, %91 : vector<16x128xi1>
    %103 = arith.ori %102, %93 : vector<16x128xi1>
    %104 = arith.ori %103, %95 : vector<16x128xi1>
    %105 = arith.ori %104, %97 : vector<16x128xi1>
    %106 = arith.ori %105, %99 : vector<16x128xi1>
    %c126_i32 = arith.constant 126 : i32
    %107 = tpu.dynamic_rotate %60 by %c126_i32 dim 1 : vector<16x128xf32>, i32 -> vector<16x128xf32>
    %108 = arith.select %83, %107, %60 : vector<16x128xi1>, vector<16x128xf32>
    %c2_i32_27 = arith.constant 2 : i32
    %109 = tpu.dynamic_rotate %108 by %c2_i32_27 dim 1 : vector<16x128xf32>, i32 -> vector<16x128xf32>
    %110 = arith.select %106, %109, %108 : vector<16x128xi1>, vector<16x128xf32>
    %c0_28 = arith.constant 0 : index
    %c0_29 = arith.constant 0 : index
    %c0_30 = arith.constant 0 : index
    %111 = vector.load %arg2[%c0_28, %c0_29, %c0_30] : memref<1x16x128xf32, #tpu.memory_space<vmem>>, vector<1x16x128xf32>
    %112 = vector.shape_cast %111 : vector<1x16x128xf32> to vector<16x128xf32>
    %113 = vector.shape_cast %110 : vector<16x128xf32> to vector<1x16x128xf32>
    tpu.vector_store %arg2[%c0_28, %c0_29, %c0_30], %113 {strides = array<i32>} : memref<1x16x128xf32, #tpu.memory_space<vmem>>, vector<1x16x128xf32>,
    return
  }
  func.func @transform_0(%arg0: i32) -> (i32, i32, i32) {
    %c0_i32 = arith.constant 0 : i32
    %c0_i32_0 = arith.constant 0 : i32
    %c0_i32_1 = arith.constant 0 : i32
    return %arg0, %c0_i32, %c0_i32_0 : i32, i32, i32
  }
  func.func @transform_1(%arg0: i32) -> (i32, i32, i32) {
    %c0_i32 = arith.constant 0 : i32
    %c0_i32_0 = arith.constant 0 : i32
    %c0_i32_1 = arith.constant 0 : i32
    return %arg0, %c0_i32, %c0_i32_0 : i32, i32, i32
  }
}

</mosaic_0001>

<bundles_post_ra>
// kernel: tpu_custom_call.1
= control target key start
LH: loop header
LB: loop body
LE: loop exit
PB: predicated region body
PF: predicated region fallthrough
CT: control target
= control target key end

     0   :  { %6 = vsyncpa [#allocation3], 0  ;;  %s340_s0 = inlined_call_operand.hbm [shape: f32[1,16,128], index: 0, kind: input, shape index: {}]   ;;  %s341_s1 = inlined_call_operand.hbm [shape: f32[1,16,128], index: 1, kind: output, shape index: {}]  }
   0x1   :  { %7 = vsyncpa [#allocation4], 0  ;;  %s249_s6 = smov [#allocation2]   ;;  %s201_s10 = scalar_lea.hbm %s340_s0, 256 }
   0x2   :  { %s13_s7 = sshll.u32 %s249_s6, 4  ;;  %p202_p0 = scmp.ne.s32.totalorder %s340_s0, %s201_s10  ;;  %s14_s7 = int_to_ptr.vmem [resolvable:$true] %s13_s7 }
   0x3   :  { %p205_p1 = scmp.lt.u32.totalorder %s201_s10, %s340_s0 }
   0x5   :  { %p207_p2 = pnand %p205_p1, %p202_p0 }
   0x7   :  { %210 = shalt.err (!%p207_p2)
}
   0x8   :  { %s211_s15 = scalar_lea.vmem %s14_s7, 256  ;;  %p216_p4 = scmp.lt.s32.totalorder %s14_s7, %s14_s7 }
   0x9   :  { %p212_p3 = scmp.ne.s32.totalorder %s14_s7, %s211_s15  ;;  %p217_p5 = scmp.lt.s32.totalorder %s211_s15, %s211_s15 }
   0xb   :  { %p218_p6 = por %p217_p5, %p216_p4 }
   0xd   :  { %p219_p7 = pnand %p218_p6, %p212_p3 }
   0xf   :  { %222 = shalt.err (!%p219_p7)
}
  0x10   :  { %s250_s16 = smov 128   ;;  %s251_s17 = smov 8  }
  0x11   :  { %19 = dma.hbm_to_vmem [thread:$0]  %s340_s0, 256, %s14_s7, [#allocation3], %s250_s16, %s250_s16, %s251_s17  }
  0x12   :  { %245 = dma.done.wait [#allocation3], 256  }
  0x13   :  { %246 = vsyncadd [#allocation3], 4294967040  ;;  %v27_v0 = vlaneseq  ;;  %v286_v2 = vld [vmem:[#allocation2 + $0x8] sm:$0xff]  ;;  %v288_v3 = vld [vmem:[#allocation2] sm:$0xff]  ;;  %s252_s20 = smov 1   ;;  %s253_s0 = smov 127  }
  0x14   :  { %59 = vrot.lane.b32.xlu1 %v286_v2, %s252_s20  ;;  %57 = vrot.lane.b32.xlu0 %v288_v3, %s252_s20  ;;  %v25_v4 = vrot.slane %v288_v3, 7  ;;  %v26_v5 = vrot.slane %v286_v2, 7  ;;  %v32_v8 = vrot.slane %v288_v3, 1  ;;  %v33_v9 = vrot.slane %v286_v2, 1  ;;  %s255_s21 = smov 126   ;;  %s256_s22 = smov 2  }
  0x15   :  { %v284_v1 = vshrl.u32 %v27_v0, 7  ;;  %v254_v20 = vmov 0.0   ;;  %s257_s23 = smov [#allocation5]  }
  0x16   :  { %s180_s24 = sshll.u32 %s257_s23, 4  ;;  %s181_s24 = int_to_ptr.vmem [resolvable:$true] %s180_s24 }
  0x17   :  { %vm29_vm0 = vcmp.lt.s32.totalorder %v284_v1, 1  ;;  %vm34_vm1 = vcmp.lt.s32.totalorder %v284_v1, 7  ;;  %v110_v53 = vadd.s32 8, %v284_v1  ;;  %s223_s25 = scalar_lea.vmem %s181_s24, 256  ;;  %p228_p9 = scmp.lt.s32.totalorder %s181_s24, %s181_s24 }
  0x18   :  { %v31_v6 = vsel %vm29_vm0, %v26_v5, %v25_v4  ;;  %v30_v7 = vsel %vm29_vm0, %v25_v4, %v26_v5  ;;  %v36_v10 = vsel %vm34_vm1, %v33_v9, %v32_v8  ;;  %v35_v11 = vsel %vm34_vm1, %v32_v8, %v33_v9  ;;  %p224_p8 = scmp.ne.s32.totalorder %s181_s24, %s223_s25  ;;  %p229_p10 = scmp.lt.s32.totalorder %s223_s25, %s223_s25 }
  0x19   :  { %49 = vrot.lane.b32.xlu1 %v31_v6, %s253_s0  ;;  %37 = vrot.lane.b32.xlu0 %v31_v6, %s252_s20  ;;  %vm45_vm2 = vcmp.ge.f32.partialorder %v31_v6, %v288_v3  ;;  %vm46_vm3 = vcmp.ge.f32.partialorder %v30_v7, %v286_v2  ;;  %vm82_vm6 = vcmp.ge.f32.partialorder %v36_v10, %v286_v2  ;;  %v112_v4 = vand.u32 127, %v27_v0 }
  0x1a   :  { %vm81_vm7 = vcmp.ge.f32.partialorder %v35_v11, %v288_v3  ;;  %v47_v21 = vsel %vm45_vm2, 64.0, %v254_v20  ;;  %v48_v22 = vsel %vm46_vm3, 64.0, %v254_v20  ;;  %v84_v29 = vsel %vm82_vm6, 2.0, %v254_v20  ;;  %p230_p11 = por %p229_p10, %p228_p9 }
  0x1b   :  { %v83_v30 = vsel %vm81_vm7, 2.0, %v254_v20  ;;  %vm123_vm2 = vcmp.eq.s32.totalorder %v110_v53, 15  ;;  %vm126_vm3 = vcmp.lt.s32.totalorder %v284_v1, 2  ;;  %vm131_vm6 = vcmp.eq.s32.totalorder %v112_v4, 0 }
  0x1c   :  { %vm132_vm7 = vcmp.eq.s32.totalorder %v112_v4, 16  ;;  %p231_p12 = pnand %p230_p11, %p224_p8 }
  0x1d   :  { %51 = vrot.lane.b32.xlu1 %v30_v7, %s253_s0  ;;  %39 = vrot.lane.b32.xlu0 %v30_v7, %s252_s20 }
  0x21   :  { %67 = vrot.lane.b32.xlu1 %v286_v2, %s253_s0  ;;  %65 = vrot.lane.b32.xlu0 %v288_v3, %s253_s0 }
  0x25   :  { %75 = vrot.lane.b32.xlu1 %v36_v10, %s252_s20  ;;  %73 = vrot.lane.b32.xlu0 %v35_v11, %s252_s20 }
  0x29   :  { %87 = vrot.lane.b32.xlu1 %v36_v10, %s253_s0  ;;  %85 = vrot.lane.b32.xlu0 %v35_v11, %s253_s0 }
  0x86   :  { %v60_v12 = vpop.permute.xlu1 %59  ;;  %v58_v13 = vpop.permute.xlu0 %57 }
  0x87   :  { %vm62_vm10 = vcmp.ge.f32.partialorder %v60_v12, %v286_v2  ;;  %vm61_vm11 = vcmp.ge.f32.partialorder %v58_v13, %v288_v3 }
  0x88   :  { %v64_v31 = vsel %vm62_vm10, 16.0, %v254_v20  ;;  %v63_v32 = vsel %vm61_vm11, 16.0, %v254_v20  ;;  %vm134_vm10 = vcmp.eq.s32.totalorder %v112_v4, 48 }
  0x8b   :  { %v50_v14 = vpop.permute.xlu1 %49  ;;  %v38_v15 = vpop.permute.xlu0 %37 }
  0x8c   :  { %vm53_vm4 = vcmp.ge.f32.partialorder %v50_v14, %v288_v3  ;;  %vm41_vm5 = vcmp.ge.f32.partialorder %v38_v15, %v288_v3 }
  0x8d   :  { %v55_v25 = vsel %vm53_vm4, 32.0, %v254_v20  ;;  %v43_v26 = vsel %vm41_vm5, 128.0, %v254_v20  ;;  %vm113_vm4 = vcmp.eq.s32.totalorder %v284_v1, 0  ;;  %vm117_vm5 = vcmp.lt.s32.totalorder %v284_v1, 6 }
  0x8e   :  { %v95_v33 = vadd.f32 %v63_v32, %v55_v25  ;;  %v93_v34 = vadd.f32 %v47_v21, %v43_v26 }
  0x8f   :  { %v52_v16 = vpop.permute.xlu1 %51  ;;  %v40_v17 = vpop.permute.xlu0 %39 }
  0x90   :  { %vm54_vm8 = vcmp.ge.f32.partialorder %v52_v16, %v286_v2  ;;  %vm42_vm9 = vcmp.ge.f32.partialorder %v40_v17, %v286_v2  ;;  %v101_v49 = vadd.f32 %v95_v33, %v93_v34 }
  0x91   :  { %v56_v27 = vsel %vm54_vm8, 32.0, %v254_v20  ;;  %v44_v28 = vsel %vm42_vm9, 128.0, %v254_v20  ;;  %vm133_vm8 = vcmp.eq.s32.totalorder %v112_v4, 32  ;;  %vm139_vm9 = vmor %vm131_vm6, %vm132_vm7  ;;  %vm147_vm6 = vcmp.eq.s32.totalorder %v112_v4, 31 }
  0x92   :  { %v96_v39 = vadd.f32 %v64_v31, %v56_v27  ;;  %v94_v40 = vadd.f32 %v48_v22, %v44_v28  ;;  %vm140_vm11 = vmor %vm139_vm9, %vm133_vm8  ;;  %vm148_vm7 = vcmp.eq.s32.totalorder %v112_v4, 47  ;;  %vm149_vm9 = vcmp.eq.s32.totalorder %v112_v4, 63 }
  0x93   :  { %v68_v18 = vpop.permute.xlu1 %67  ;;  %v66_v19 = vpop.permute.xlu0 %65 }
  0x94   :  { %vm70_vm14 = vcmp.ge.f32.partialorder %v68_v18, %v286_v2  ;;  %vm69_vm15 = vcmp.ge.f32.partialorder %v66_v19, %v288_v3  ;;  %v102_v50 = vadd.f32 %v96_v39, %v94_v40 }
  0x95   :  { %v72_v41 = vsel %vm70_vm14, 8.0, %v254_v20  ;;  %v71_v42 = vsel %vm69_vm15, 8.0, %v254_v20  ;;  %vm136_vm14 = vcmp.eq.s32.totalorder %v112_v4, 80 }
  0x97   :  { %v76_v23 = vpop.permute.xlu1 %75  ;;  %v74_v24 = vpop.permute.xlu0 %73 }
  0x98   :  { %vm78_vm12 = vcmp.ge.f32.partialorder %v76_v23, %v286_v2  ;;  %vm77_vm13 = vcmp.ge.f32.partialorder %v74_v24, %v288_v3 }
  0x99   :  { %v80_v35 = vsel %vm78_vm12, 4.0, %v254_v20  ;;  %v79_v36 = vsel %vm77_vm13, 4.0, %v254_v20  ;;  %vm135_vm12 = vcmp.eq.s32.totalorder %v112_v4, 64  ;;  %vm141_vm13 = vmor %vm140_vm11, %vm134_vm10  ;;  %vm150_vm11 = vcmp.eq.s32.totalorder %v112_v4, 79 }
  0x9a   :  { %v98_v45 = vadd.f32 %v80_v35, %v72_v41  ;;  %v97_v46 = vadd.f32 %v79_v36, %v71_v42  ;;  %vm142_vm15 = vmor %vm141_vm13, %vm135_vm12  ;;  %vm151_vm13 = vcmp.eq.s32.totalorder %v112_v4, 95 }
  0x9b   :  { %v88_v37 = vpop.permute.xlu1 %87  ;;  %v86_v38 = vpop.permute.xlu0 %85 }
  0x9c   :  { %vm90_vm0 = vcmp.ge.f32.partialorder %v88_v37, %v286_v2  ;;  %vm89_vm1 = vcmp.ge.f32.partialorder %v86_v38, %v288_v3 }
  0x9d   :  { %v92_v43 = vsel %vm90_vm0, 1.0, %v254_v20  ;;  %v91_v44 = vsel %vm89_vm1, 1.0, %v254_v20  ;;  %vm137_vm0 = vcmp.eq.s32.totalorder %v112_v4, 96  ;;  %vm143_vm1 = vmor %vm142_vm15, %vm136_vm14  ;;  %vm152_vm15 = vcmp.eq.s32.totalorder %v112_v4, 111 }
  0x9e   :  { %v100_v47 = vadd.f32 %v92_v43, %v84_v29  ;;  %v99_v48 = vadd.f32 %v91_v44, %v83_v30 }
  0xa0   :  { %v104_v51 = vadd.f32 %v100_v47, %v98_v45  ;;  %v103_v52 = vadd.f32 %v99_v48, %v97_v46 }
  0xa2   :  { %v106_v54 = vadd.f32 %v104_v51, %v102_v50  ;;  %v105_v55 = vadd.f32 %v103_v52, %v101_v49 }
  0xa4   :  { %v108_v56 = vmul.f32 0.003921569, %v105_v55  ;;  %v109_v57 = vmul.f32 0.003921569, %v106_v54 }
  0xa6   :  { %v124_v58 = vrot.slane %v108_v56, 6  ;;  %v125_v59 = vrot.slane %v109_v57, 6  ;;  %v115_v60 = vrot.slane %v108_v56, 2  ;;  %v116_v61 = vrot.slane %v109_v57, 2 }
  0xa8   :  { %v127_v62 = vsel %vm126_vm3, %v124_v58, %v125_v59  ;;  %v118_v63 = vsel %vm117_vm5, %v115_v60, %v116_v61  ;;  %vm138_vm3 = vcmp.eq.s32.totalorder %v112_v4, 112  ;;  %vm146_vm5 = vcmp.eq.s32.totalorder %v112_v4, 15 }
  0xa9   :  { %v130_v2 = vsel %vm123_vm2, %v127_v62, %v109_v57  ;;  %v120_v3 = vsel %vm113_vm4, %v118_v63, %v108_v56  ;;  %vm144_vm2 = vmor %vm143_vm1, %vm137_vm0  ;;  %vm153_vm1 = vcmp.eq.s32.totalorder %v112_v4, 127 }
  0xaa   :  { %163 = vrot.lane.b32.xlu1 %v130_v2, %s255_s21  ;;  %161 = vrot.lane.b32.xlu0 %v120_v3, %s255_s21  ;;  %vm145_vm4 = vmor %vm144_vm2, %vm138_vm3 }
  0xab   :  { %vm154_vm8 = vmor %vm146_vm5, %vm147_vm6 }
  0xac   :  { %vm155_vm10 = vmor %vm154_vm8, %vm148_vm7 }
  0xad   :  { %vm156_vm12 = vmor %vm155_vm10, %vm149_vm9 }
  0xae   :  { %vm157_vm14 = vmor %vm156_vm12, %vm150_vm11 }
  0xaf   :  { %vm158_vm0 = vmor %vm157_vm14, %vm151_vm13 }
  0xb0   :  { %vm159_vm3 = vmor %vm158_vm0, %vm152_vm15 }
  0xb1   :  { %vm160_vm2 = vmor %vm159_vm3, %vm153_vm1 }
 0x11c   :  { %v164_v1 = vpop.permute.xlu1 %163  ;;  %v162_v5 = vpop.permute.xlu0 %161 }
 0x11d   :  { %v166_v6 = vsel %vm145_vm4, %v164_v1, %v130_v2  ;;  %v165_v7 = vsel %vm145_vm4, %v162_v5, %v120_v3 }
 0x11e   :  { %169 = vrot.lane.b32.xlu1 %v166_v6, %s256_s22  ;;  %167 = vrot.lane.b32.xlu0 %v165_v7, %s256_s22 }
 0x190   :  { %v170_v0 = vpop.permute.xlu1 %169  ;;  %v168_v8 = vpop.permute.xlu0 %167 }
 0x191   :  { %v172_v9 = vsel %vm160_vm2, %v170_v0, %v166_v6  ;;  %v171_v10 = vsel %vm160_vm2, %v168_v8, %v165_v7 }
 0x192   :  { %174 = vst [vmem:[#allocation5 + $0x8] sm:$0xff] %v172_v9  ;;  %173 = vst [vmem:[#allocation5] sm:$0xff] %v171_v10 }
 0x193   :  { %234 = shalt.err (!%p231_p12)
}
 0x194   :  { %s235_s28 = scalar_lea.hbm %s341_s1, 256 }
 0x195   :  { %p236_p13 = scmp.ne.s32.totalorder %s341_s1, %s235_s28  ;;  %p239_p0 = scmp.lt.u32.totalorder %s235_s28, %s341_s1 }
 0x197   :  { %p241_p1 = pnand %p239_p0, %p236_p13 }
 0x199   :  { %244 = shalt.err (!%p241_p1)
}
 0x19a   :  { %186 = dma.vmem_to_hbm [thread:$0]  %s181_s24, 256, %s341_s1, [#allocation4], %s250_s16, %s250_s16, %s251_s17  }
 0x19b   :  { %247 = dma.done.wait [#allocation4], 256  }
 0x19c   :  { %248 = vsyncadd [#allocation4], 4294967040 }
 0x19d   :  { %190 = vsyncpa [#allocation3], 1 }
 0x19e   :  { %191 = vsyncpa [#allocation4], 1 }

</bundles_post_ra>
